<compile_context>
chip_gen: v7x
topology: tpu7x:2x2x1
jax: 0.10.0
libtpu: 0.0.40
codegen_flags: <defaults>
</compile_context>

<pallas_src>
import functools

import numpy as np
import jax
import jax.numpy as jnp
from jax import lax
from jax.experimental import pallas as pl
from jax.experimental.pallas import tpu as pltpu

SIZES = (1, 2, 3, 6)          # pyramid pooling output sizes
PCOLS = 128                   # lane-padded total of sum(s*s) = 50 pooled cols


# ----------------------------------------------------------------------------
# Host-side constant builders (deterministic, tiny)
# ----------------------------------------------------------------------------
def adaptive_pool_matrix(in_size, out_size):
    """Row i averages input indices [floor(i*in/out), ceil((i+1)*in/out))."""
    m = np.zeros((out_size, in_size), dtype=np.float32)
    for i in range(out_size):
        start = (i * in_size) // out_size
        end = ((i + 1) * in_size + out_size - 1) // out_size      # ceil
        m[i, start:end] = 1.0 / (end - start)
    return m


def bilinear_upsample_matrix(in_size, out_size):
    """PyTorch bilinear interpolation, align_corners=False (F.upsample default)."""
    m = np.zeros((out_size, in_size), dtype=np.float32)
    scale = in_size / out_size
    for o in range(out_size):
        src = (o + 0.5) * scale - 0.5
        if src < 0.0:
            src = 0.0
        i0 = min(int(np.floor(src)), in_size - 1)
        i1 = min(i0 + 1, in_size - 1)
        lam = src - i0
        m[o, i0] += 1.0 - lam
        m[o, i1] += lam
    return m


def build_cat_matrices(H, W, HWp):
    """Pack all four stages into one pool matrix and one upsample matrix.

    Returns (HW rows/cols padded with zeros up to HWp):
      pcatT : (HWp, PCOLS)  columns [off_s, off_s+s*s) hold P_s^T, rest zero
      ucatT : (PCOLS, HWp)  rows    [off_s, off_s+s*s) hold U_s^T, rest zero
      col_blocks : tuple of (off, s*s) per stage (SIZES order)
    """
    HW = H * W
    pcatT = np.zeros((HWp, PCOLS), dtype=np.float32)
    ucatT = np.zeros((PCOLS, HWp), dtype=np.float32)
    col_blocks = []
    off = 0
    for s in SIZES:
        ss = s * s
        p2d = np.kron(adaptive_pool_matrix(H, s),
                      adaptive_pool_matrix(W, s))                  # (ss, HW)
        u2d = np.kron(bilinear_upsample_matrix(s, H),
                      bilinear_upsample_matrix(s, W))              # (HW, ss)
        pcatT[:HW, off:off + ss] = p2d.T
        ucatT[off:off + ss, :HW] = u2d.T
        col_blocks.append((off, ss))
        off += ss
    assert off <= PCOLS
    return pcatT, ucatT, tuple(col_blocks)


# ----------------------------------------------------------------------------
# Pass 1: pooled accumulation over HW tiles + folded-weight contraction -> Q
# ----------------------------------------------------------------------------
def pool_fold_kernel(x_ref, pcat_ref, wpk_ref, q_ref,
                     pooled_acc, blk_ref, *, col_blocks):
    t = pl.program_id(1)

    @pl.when(t == 0)
    def _init():
        pooled_acc[...] = jnp.zeros_like(pooled_acc)

    # all four adaptive-avg-pools for this HW tile, one lane-dense matmul
    pooled_acc[...] += jnp.dot(x_ref[0], pcat_ref[...],
                               preferred_element_type=jnp.float32)

    @pl.when(t == pl.num_programs(1) - 1)
    def _finalize():
        C = pooled_acc.shape[0]
        pooled = pooled_acc[...]                      # (C, 128) f32
        # block-diagonal layout; mask in f32, cast once (v5e has no bf16 VPU)
        col = lax.broadcasted_iota(jnp.int32, pooled.shape, 1)
        for s, (off, ss) in enumerate(col_blocks):
            keep = jnp.logical_and(col >= off, col < off + ss)
            blk_ref[s * C:(s + 1) * C, :] = jnp.where(
                keep, pooled, jnp.zeros_like(pooled))
        # Q = [A_1 A_2 A_3 A_6] @ blkdiag   (OC, 128)
        q_ref[0] = jnp.dot(wpk_ref[...], blk_ref[...].astype(wpk_ref.dtype),
                           preferred_element_type=jnp.float32
                           ).astype(q_ref.dtype)


# ----------------------------------------------------------------------------
# Pass 2: per-HW-tile upsample + identity branch + bias + ReLU
# ----------------------------------------------------------------------------
def upsample_out_kernel(q_ref, x_ref, ucat_ref, wid_ref, b_ref, o_ref):
    cdtype = x_ref.dtype
    # all four bilinear upsamples for this tile, already weight-contracted
    up = jnp.dot(q_ref[0].astype(cdtype), ucat_ref[...],
                 preferred_element_type=jnp.float32)               # (OC, T)
    # identity branch consumed in place (no VMEM concat copy)
    idc = jnp.dot(wid_ref[...], x_ref[0],
                  preferred_element_type=jnp.float32)              # (OC, T)
    out = up + idc + b_ref[...]                                    # f32 VPU add
    o_ref[0] = jnp.maximum(out, 0.0).astype(o_ref.dtype)


# ----------------------------------------------------------------------------
# Wrapper
# ----------------------------------------------------------------------------
def pyramid_pool(feats, stage_w, bottleneck_w, bottleneck_b, *,
                 compute_dtype=jnp.bfloat16, out_dtype=jnp.float32,
                 hw_tile=512):
    """feats: (N, C, H, W) float32 -> (N, OC, H, W) out_dtype."""
    N, C, H, W = feats.shape
    OC = bottleneck_w.shape[0]
    ns = len(SIZES)
    HW = H * W

    # lane-dense HW tiling (tile is a multiple of 128); pad HW to tile multiple
    T = max(128, (hw_tile // 128) * 128)
    HWp = ((HW + T - 1) // T) * T
    n_hw = HWp // T

    pcatT, ucatT, col_blocks = build_cat_matrices(H, W, HWp)

    # Fold each stage 1x1 conv into its bottleneck column block.
    wpk = jnp.concatenate(
        [bottleneck_w[:, s * C:(s + 1) * C] @ stage_w[s] for s in range(ns)],
        axis=1)                                                    # (OC, 4C)
    wid = bottleneck_w[:, ns * C:(ns + 1) * C]                     # (OC, C)
    bias = bottleneck_b.reshape(OC, 1).astype(jnp.float32)         # f32 add

    x_flat = feats.reshape(N, C, HW).astype(compute_dtype)
    if HWp != HW:
        x_flat = jnp.pad(x_flat, ((0, 0), (0, 0), (0, HWp - HW)))
    pcatT_j = jnp.asarray(pcatT, dtype=compute_dtype)
    ucatT_j = jnp.asarray(ucatT, dtype=compute_dtype)
    wpk = wpk.astype(compute_dtype)
    wid = wid.astype(compute_dtype)

    vmem_limit = 64 * 1024 * 1024   # raise v5e/v6e scoped default; <= physical

    # ---- pass 1: Q (N, OC, 128), hw-tile reduction axis last ('arbitrary')
    q = pl.pallas_call(
        functools.partial(pool_fold_kernel, col_blocks=col_blocks),
        out_shape=jax.ShapeDtypeStruct((N, OC, PCOLS), jnp.float32),
        grid=(N, n_hw),
        in_specs=[pl.BlockSpec((1, C, T), lambda n, t: (n, 0, t)),
                  pl.BlockSpec((T, PCOLS), lambda n, t: (t, 0)),
                  pl.BlockSpec((OC, ns * C), lambda n, t: (0, 0))],
        out_specs=pl.BlockSpec((1, OC, PCOLS), lambda n, t: (n, 0, 0)),
        scratch_shapes=[pltpu.VMEM((C, PCOLS), jnp.float32),
                        pltpu.VMEM((ns * C, PCOLS), jnp.float32)],
        compiler_params=pltpu.CompilerParams(
            dimension_semantics=("parallel", "arbitrary"),
            vmem_limit_bytes=vmem_limit),
    )(x_flat, pcatT_j, wpk)

    # ---- pass 2: output tiles; hw-tile axis leading + parallel (v7x 2 TCs)
    out = pl.pallas_call(
        upsample_out_kernel,
        out_shape=jax.ShapeDtypeStruct((N, OC, HWp), out_dtype),
        grid=(n_hw, N),
        in_specs=[pl.BlockSpec((1, OC, PCOLS), lambda t, n: (n, 0, 0)),
                  pl.BlockSpec((1, C, T), lambda t, n: (n, 0, t)),
                  pl.BlockSpec((PCOLS, T), lambda t, n: (0, t)),
                  pl.BlockSpec((OC, C), lambda t, n: (0, 0)),
                  pl.BlockSpec((OC, 1), lambda t, n: (0, 0))],
        out_specs=pl.BlockSpec((1, OC, T), lambda t, n: (n, 0, t)),
        compiler_params=pltpu.CompilerParams(
            dimension_semantics=("parallel", "parallel"),
            vmem_limit_bytes=vmem_limit),
    )(q, x_flat, ucatT_j, wid, bias)

    return out[:, :, :HW].reshape(N, OC, H, W)


# ----------------------------------------------------------------------------
# Pure-JAX reference (unfolded, mirrors the PyTorch graph) for sanity checks
# ----------------------------------------------------------------------------
def reference(feats, stage_w, bottleneck_w, bottleneck_b):
    N, C, H, W = feats.shape
    xf = feats.reshape(N, C, H * W)
    priors = []
    for idx, s in enumerate(SIZES):
        p2d = jnp.asarray(np.kron(adaptive_pool_matrix(H, s),
                                  adaptive_pool_matrix(W, s)))      # (ss, HW)
        u2d = jnp.asarray(np.kron(bilinear_upsample_matrix(s, H),
                                  bilinear_upsample_matrix(s, W)))  # (HW, ss)
        pooled = jnp.einsum('ncj,ij->nci', xf, p2d)
        mixed = jnp.einsum('dc,nci->ndi', stage_w[idx], pooled)
        up = jnp.einsum('oi,ndi->ndo', u2d, mixed)
        priors.append(up)
    priors.append(xf)
    cat = jnp.concatenate(priors, axis=1)                           # (N, 5C, HW)
    out = (jnp.einsum('oc,nci->noi', bottleneck_w, cat)
           + bottleneck_b[None, :, None])
    return jnp.maximum(out, 0.0).reshape(N, -1, H, W)


if __name__ == "__main__":
    # Small shapes consistent with the module (features=C, out_features=OC).
    N, C, H, W = 2, 4, 16, 16
    OC = 32

    key = jax.random.PRNGKey(0)
    k_x, k_ws, k_wb, k_b = jax.random.split(key, 4)

    feats = jax.random.normal(k_x, (N, C, H, W), dtype=jnp.float32)
    # Stage 1x1 convs (no bias): one (C, C) weight per pyramid size.
    stage_w = jax.random.normal(k_ws, (len(SIZES), C, C), dtype=jnp.float32) * 0.2
    # Bottleneck 1x1 conv: (OC, 5*C) weight + (OC,) bias.
    bottleneck_w = jax.random.normal(k_wb, (OC, C * (len(SIZES) + 1)),
                                     dtype=jnp.float32) * 0.1
    bottleneck_b = jax.random.normal(k_b, (OC,), dtype=jnp.float32) * 0.1

    ref = reference(feats, stage_w, bottleneck_w, bottleneck_b)

    # Exact-precision path (f32 operands), two 128-lane HW tiles: tight check.
    out_f32 = jax.block_until_ready(
        pyramid_pool(feats, stage_w, bottleneck_w, bottleneck_b,
                     compute_dtype=jnp.float32, hw_tile=128))
    np.testing.assert_allclose(np.asarray(out_f32), np.asarray(ref),
                               rtol=1e-4, atol=1e-4)

    # bf16 fast path (MXU-native operands, f32 accumulation) with a single
    # padded 512-lane tile (exercises the HW-padding path).
    out_bf16 = jax.block_until_ready(
        pyramid_pool(feats, stage_w, bottleneck_w, bottleneck_b,
                     compute_dtype=jnp.bfloat16, hw_tile=512))
    np.testing.assert_allclose(np.asarray(out_bf16), np.asarray(ref),
                               rtol=3e-2, atol=3e-2)

    assert out_f32.shape == (N, OC, H, W)
    print("KERNEL_OK")
</pallas_src>

<mosaic_0001>
module attributes {stable_mosaic.version = 11 : i64} {
  func.func @pool_fold_kernel(%arg0: i32, %arg1: i32, %arg2: memref<1x4x128xf32, #tpu.memory_space<vmem>>, %arg3: memref<128x128xf32, #tpu.memory_space<vmem>>, %arg4: memref<32x16xf32, #tpu.memory_space<vmem>>, %arg5: memref<1x32x128xf32, #tpu.memory_space<vmem>>, %arg6: memref<4x128xf32, #tpu.memory_space<vmem>>, %arg7: memref<16x128xf32, #tpu.memory_space<vmem>>) attributes {dimension_semantics = [#tpu.dimension_semantics<parallel>, #tpu.dimension_semantics<arbitrary>], iteration_bounds = array<i64: 2, 2>, scalar_prefetch = 0 : i64, scratch_operands = 2 : i64, tpu.core_type = #tpu.core_type<tc>, window_params = [{transform_indices = @transform_0, window_bounds = array<i64: 1, 4, 128>}, {transform_indices = @transform_1, window_bounds = array<i64: 128, 128>}, {pipeline_mode = #tpu.pipeline_mode<synchronous>, transform_indices = @transform_2, window_bounds = array<i64: 32, 16>}, {transform_indices = @transform_3, window_bounds = array<i64: 1, 32, 128>}]} {
    %c0_i32 = arith.constant 0 : i32
    %0 = arith.cmpi eq, %arg1, %c0_i32 : i32
    %1 = arith.extui %0 : i1 to i32
    %c0_i32_0 = arith.constant 0 : i32
    %2 = arith.cmpi ne, %1, %c0_i32_0 : i32
    scf.if %2 {
      %cst_10 = arith.constant 0.000000e+00 : f32
      %13 = vector.broadcast %cst_10 : f32 to vector<4x128xf32>
      %c0_11 = arith.constant 0 : index
      %c0_12 = arith.constant 0 : index
      %14 = vector.load %arg6[%c0_11, %c0_12] : memref<4x128xf32, #tpu.memory_space<vmem>>, vector<4x128xf32>
      tpu.vector_store %arg6[%c0_11, %c0_12], %13 {strides = array<i32>} : memref<4x128xf32, #tpu.memory_space<vmem>>, vector<4x128xf32>,
    } else {
    }
    %c0 = arith.constant 0 : index
    %c0_1 = arith.constant 0 : index
    %3 = vector.load %arg6[%c0, %c0_1] : memref<4x128xf32, #tpu.memory_space<vmem>>, vector<4x128xf32>
    %c0_2 = arith.constant 0 : index
    %c0_3 = arith.constant 0 : index
    %c0_4 = arith.constant 0 : index
    %4 = vector.load %arg2[%c0_2, %c0_3, %c0_4] : memref<1x4x128xf32, #tpu.memory_space<vmem>>, vector<1x4x128xf32>
    %5 = vector.shape_cast %4 : vector<1x4x128xf32> to vector<4x128xf32>
    %c0_5 = arith.constant 0 : index
    %c0_6 = arith.constant 0 : index
    %6 = vector.load %arg3[%c0_5, %c0_6] : memref<128x128xf32, #tpu.memory_space<vmem>>, vector<128x128xf32>
    %cst = arith.constant dense<0.000000e+00> : vector<4x128xf32>
    %7 = tpu.matmul %5, %6, %cst {dimension_numbers = #tpu.dot_dimension_numbers<[1], [0], [0], [1], [0, 0, 1, 1], [], []>} : vector<4x128xf32>, vector<128x128xf32>, vector<4x128xf32> -> vector<4x128xf32>
    %8 = arith.addf %3, %7 : vector<4x128xf32>
    %c0_7 = arith.constant 0 : index
    %c0_8 = arith.constant 0 : index
    %9 = vector.load %arg6[%c0_7, %c0_8] : memref<4x128xf32, #tpu.memory_space<vmem>>, vector<4x128xf32>
    tpu.vector_store %arg6[%c0_7, %c0_8], %8 {strides = array<i32>} : memref<4x128xf32, #tpu.memory_space<vmem>>, vector<4x128xf32>,
    %c1_i32 = arith.constant 1 : i32
    %10 = arith.cmpi eq, %arg1, %c1_i32 : i32
    %11 = arith.extui %10 : i1 to i32
    %c0_i32_9 = arith.constant 0 : i32
    %12 = arith.cmpi ne, %11, %c0_i32_9 : i32
    scf.if %12 {
      %c0_10 = arith.constant 0 : index
      %c0_11 = arith.constant 0 : index
      %13 = vector.load %arg6[%c0_10, %c0_11] : memref<4x128xf32, #tpu.memory_space<vmem>>, vector<4x128xf32>
      %14 = tpu.iota {dimensions = array<i32: 1>} : vector<4x128xi32>
      %c0_i32_12 = arith.constant 0 : i32
      %15 = vector.broadcast %c0_i32_12 : i32 to vector<4x128xi32>
      %16 = arith.cmpi sge, %14, %15 : vector<4x128xi32>
      %c1_i32_13 = arith.constant 1 : i32
      %17 = vector.broadcast %c1_i32_13 : i32 to vector<4x128xi32>
      %18 = arith.cmpi slt, %14, %17 : vector<4x128xi32>
      %19 = arith.andi %16, %18 : vector<4x128xi1>
      %cst_14 = arith.constant 0.000000e+00 : f32
      %20 = vector.broadcast %cst_14 : f32 to vector<4x128xf32>
      %21 = arith.select %19, %13, %20 : vector<4x128xi1>, vector<4x128xf32>
      %c0_15 = arith.constant 0 : index
      %c0_16 = arith.constant 0 : index
      %22 = vector.load %arg7[%c0_15, %c0_16] : memref<16x128xf32, #tpu.memory_space<vmem>>, vector<4x128xf32>
      tpu.vector_store %arg7[%c0_15, %c0_16], %21 {strides = array<i32>} : memref<16x128xf32, #tpu.memory_space<vmem>>, vector<4x128xf32>,
      %c1_i32_17 = arith.constant 1 : i32
      %23 = vector.broadcast %c1_i32_17 : i32 to vector<4x128xi32>
      %24 = arith.cmpi sge, %14, %23 : vector<4x128xi32>
      %c5_i32 = arith.constant 5 : i32
      %25 = vector.broadcast %c5_i32 : i32 to vector<4x128xi32>
      %26 = arith.cmpi slt, %14, %25 : vector<4x128xi32>
      %27 = arith.andi %24, %26 : vector<4x128xi1>
      %cst_18 = arith.constant 0.000000e+00 : f32
      %28 = vector.broadcast %cst_18 : f32 to vector<4x128xf32>
      %29 = arith.select %27, %13, %28 : vector<4x128xi1>, vector<4x128xf32>
      %c4 = arith.constant 4 : index
      %c0_19 = arith.constant 0 : index
      %30 = vector.load %arg7[%c4, %c0_19] : memref<16x128xf32, #tpu.memory_space<vmem>>, vector<4x128xf32>
      tpu.vector_store %arg7[%c4, %c0_19], %29 {strides = array<i32>} : memref<16x128xf32, #tpu.memory_space<vmem>>, vector<4x128xf32>,
      %c5_i32_20 = arith.constant 5 : i32
      %31 = vector.broadcast %c5_i32_20 : i32 to vector<4x128xi32>
      %32 = arith.cmpi sge, %14, %31 : vector<4x128xi32>
      %c14_i32 = arith.constant 14 : i32
      %33 = vector.broadcast %c14_i32 : i32 to vector<4x128xi32>
      %34 = arith.cmpi slt, %14, %33 : vector<4x128xi32>
      %35 = arith.andi %32, %34 : vector<4x128xi1>
      %cst_21 = arith.constant 0.000000e+00 : f32
      %36 = vector.broadcast %cst_21 : f32 to vector<4x128xf32>
      %37 = arith.select %35, %13, %36 : vector<4x128xi1>, vector<4x128xf32>
      %c8 = arith.constant 8 : index
      %c0_22 = arith.constant 0 : index
      %38 = vector.load %arg7[%c8, %c0_22] : memref<16x128xf32, #tpu.memory_space<vmem>>, vector<4x128xf32>
      tpu.vector_store %arg7[%c8, %c0_22], %37 {strides = array<i32>} : memref<16x128xf32, #tpu.memory_space<vmem>>, vector<4x128xf32>,
      %c14_i32_23 = arith.constant 14 : i32
      %39 = vector.broadcast %c14_i32_23 : i32 to vector<4x128xi32>
      %40 = arith.cmpi sge, %14, %39 : vector<4x128xi32>
      %c50_i32 = arith.constant 50 : i32
      %41 = vector.broadcast %c50_i32 : i32 to vector<4x128xi32>
      %42 = arith.cmpi slt, %14, %41 : vector<4x128xi32>
      %43 = arith.andi %40, %42 : vector<4x128xi1>
      %cst_24 = arith.constant 0.000000e+00 : f32
      %44 = vector.broadcast %cst_24 : f32 to vector<4x128xf32>
      %45 = arith.select %43, %13, %44 : vector<4x128xi1>, vector<4x128xf32>
      %c12 = arith.constant 12 : index
      %c0_25 = arith.constant 0 : index
      %46 = vector.load %arg7[%c12, %c0_25] : memref<16x128xf32, #tpu.memory_space<vmem>>, vector<4x128xf32>
      tpu.vector_store %arg7[%c12, %c0_25], %45 {strides = array<i32>} : memref<16x128xf32, #tpu.memory_space<vmem>>, vector<4x128xf32>,
      %c0_26 = arith.constant 0 : index
      %c0_27 = arith.constant 0 : index
      %47 = vector.load %arg4[%c0_26, %c0_27] : memref<32x16xf32, #tpu.memory_space<vmem>>, vector<32x16xf32>
      %c0_28 = arith.constant 0 : index
      %c0_29 = arith.constant 0 : index
      %48 = vector.load %arg7[%c0_28, %c0_29] : memref<16x128xf32, #tpu.memory_space<vmem>>, vector<16x128xf32>
      %cst_30 = arith.constant dense<0.000000e+00> : vector<32x128xf32>
      %49 = tpu.matmul %47, %48, %cst_30 {dimension_numbers = #tpu.dot_dimension_numbers<[1], [0], [0], [1], [0, 0, 1, 1], [], []>} : vector<32x16xf32>, vector<16x128xf32>, vector<32x128xf32> -> vector<32x128xf32>
      %c0_31 = arith.constant 0 : index
      %c0_32 = arith.constant 0 : index
      %c0_33 = arith.constant 0 : index
      %50 = vector.load %arg5[%c0_31, %c0_32, %c0_33] : memref<1x32x128xf32, #tpu.memory_space<vmem>>, vector<1x32x128xf32>
      %51 = vector.shape_cast %50 : vector<1x32x128xf32> to vector<32x128xf32>
      %52 = vector.shape_cast %49 : vector<32x128xf32> to vector<1x32x128xf32>
      tpu.vector_store %arg5[%c0_31, %c0_32, %c0_33], %52 {strides = array<i32>} : memref<1x32x128xf32, #tpu.memory_space<vmem>>, vector<1x32x128xf32>,
    } else {
    }
    return
  }
  func.func @transform_0(%arg0: i32, %arg1: i32) -> (i32, i32, i32) {
    %c0_i32 = arith.constant 0 : i32
    %c0_i32_0 = arith.constant 0 : i32
    return %arg0, %c0_i32, %arg1 : i32, i32, i32
  }
  func.func @transform_1(%arg0: i32, %arg1: i32) -> (i32, i32) {
    %c0_i32 = arith.constant 0 : i32
    %c0_i32_0 = arith.constant 0 : i32
    return %arg1, %c0_i32 : i32, i32
  }
  func.func @transform_2(%arg0: i32, %arg1: i32) -> (i32, i32) {
    %c0_i32 = arith.constant 0 : i32
    %c0_i32_0 = arith.constant 0 : i32
    %c0_i32_1 = arith.constant 0 : i32
    return %c0_i32, %c0_i32_0 : i32, i32
  }
  func.func @transform_3(%arg0: i32, %arg1: i32) -> (i32, i32, i32) {
    %c0_i32 = arith.constant 0 : i32
    %c0_i32_0 = arith.constant 0 : i32
    %c0_i32_1 = arith.constant 0 : i32
    return %arg0, %c0_i32, %c0_i32_0 : i32, i32, i32
  }
}

</mosaic_0001>

<bundles_post_ra>
// kernel: tpu_custom_call.1
= control target key start
LH: loop header
LB: loop body
LE: loop exit
PB: predicated region body
PF: predicated region fallthrough
CT: control target
= control target key end

     0   :  { %s1579_s0 = inlined_call_operand.hbm [shape: f32[2,4,256], index: 0, kind: input, shape index: {}]   ;;  %s1580_s1 = inlined_call_operand.hbm [shape: f32[256,128], index: 1, kind: input, shape index: {}]   ;;  %s1581_s2 = inlined_call_operand.hbm [shape: f32[32,16], index: 2, kind: input, shape index: {}]   ;;  %s1582_s3 = inlined_call_operand.hbm [shape: f32[2,32,128], index: 3, kind: output, shape index: {}]  }
   0x1   :  { %1601 = sst [smem:[#allocation24_spill]] %s1581_s2 }
   0x2   :  { %1602 = sst [smem:[#allocation25_spill]] %s1582_s3 }
   0x3   :  { %8 = vsyncpa [#allocation5], 0 }
   0x4   :  { %10 = vsyncpa [#allocation5 + $0x1], 0 }
   0x5   :  { %11 = vsyncpa [#allocation8], 0 }
   0x6   :  { %13 = vsyncpa [#allocation8 + $0x1], 0 }
   0x7   :  { %14 = vsyncpa [#allocation6], 0 }
   0x8   :  { %16 = vsyncpa [#allocation6 + $0x1], 0  ;;  %s1172_s12 = smov 0   ;;  %s1174_s13 = smov 0  }
   0x9   :  { %s1176_s14 = smov 0   ;;  %s1178_s15 = smov 0  }
   0xa   :  { %s1180_s16 = smov 0   ;;  %s1182_s17 = smov 0  }
   0xb   :  { %s1184_s18 = smov 0   ;;  %s1186_s19 = smov 0  }
   0xc   :  { %s1188_s20 = smov 0   ;;  %s1190_s21 = smov 0  }
   0xd   :  { %s1192_s22 = smov 0   ;;  %s1194_s23 = smov 0  }
   0xe   :  { %s1196_s24 = smov 0   ;;  %s1198_s25 = smov 0  }
   0xf LB: > { %1603 = sst [smem:[#allocation15_spill]] %s1086_s12  ;;  %s1241_s26 = sadd.s32 4294967295, %s1138_s25   ;;  %s1138_s25 = sphi %s1198_s25, %s22_s25   ;;  %s1134_s24 = sphi %s1196_s24, %s1660_s24   ;;  %s1130_s23 = sphi %s1194_s23, %s1659_s23   ;;  %s1126_s22 = sphi %s1192_s22, %s1658_s22   ;;  %s1122_s21 = sphi %s1190_s21, %s1657_s21   ;;  %s1118_s20 = sphi %s1188_s20, %s1656_s20   ;;  %s1114_s19 = sphi %s1186_s19, %s1655_s19   ;;  %s1110_s18 = sphi %s1184_s18, %s1654_s18   ;;  %s1106_s17 = sphi %s1182_s17, %s1653_s17   ;;  %s1102_s16 = sphi %s1180_s16, %s1652_s16   ;;  %s1098_s15 = sphi %s1178_s15, %s1651_s15   ;;  %s1094_s14 = sphi %s1176_s14, %s1650_s14   ;;  %s1090_s13 = sphi %s1174_s13, %s1649_s13   ;;  %s1086_s12 = sphi %s1172_s12, %s1648_s12  }
  0x10   : > { %1604 = sst [smem:[#allocation16_spill]] %s1090_s13  ;;  %s620_s27 = sadd.s32 4294967294, %s1138_s25  }
  0x11   : > { %1605 = sst [smem:[#allocation17_spill]] %s1122_s21  ;;  %p1584_p0 = scmp.eq.s32.totalorder %s1241_s26, 0 }
  0x12   : > { %1606 = sst [smem:[#allocation18_spill]] %s1126_s22  ;;  %p82_p1 = scmp.ne.s32.totalorder %s1102_s16, %s1098_s15 }
  0x13   : > { %p126_p2 = scmp.ne.s32.totalorder %s1094_s14, %s1090_s13  ;;  %p127_p3 = scmp.eq.s32.totalorder %s1241_s26, 3 }
  0x14   : > { %p1251_p4 = por %p82_p1, %p1584_p0  ;;  %p132_p5 = scmp.ne.s32.totalorder %s1090_s13, %s1086_s12 }
  0x15   : > { %p1257_p6 = por %p127_p3, %p126_p2  ;;  %p133_p7 = scmp.eq.s32.totalorder %s620_s27, 3 }
  0x16   : > { %s1607_s28 = scalar_select %p1251_p4, 1, 0 }
  0x17   : > { %s1609_s29 = scalar_select %p1257_p6, 1, 0 }
  0x18   : > { %1608 = sst [smem:[#allocation19_spill]] %s1607_s28  ;;  %p621_p8 = scmp.ge.s32.totalorder %s1138_s25, 1 }
  0x19   : > { %1610 = sst [smem:[#allocation20_spill]] %s1609_s29  ;;  %p140_p9 = scmp.lt.s32.totalorder %s1138_s25, 5 }
  0x1a   : > { %p1263_p10 = por %p133_p7, %p132_p5  ;;  %s1140_s5 = smov [#allocation9]  }
  0x1b   : > { %p1267_p11 = pnand %p621_p8, %p140_p9  ;;  %s152_s6 = sshll.u32 %s1140_s5, 4  ;;  %s153_s6 = int_to_ptr.vmem [resolvable:$true] %s152_s6 }
  0x1c   : > { %s1611_s30 = scalar_select %p1263_p10, 1, 0 }
  0x1d   : > { %s1613_s4 = scalar_select %p1267_p11, 1, 0 }
  0x1e   : > { %1612 = sst [smem:[#allocation21_spill]] %s1611_s30  ;;  %p756_p12 = pneg %p1267_p11 }
  0x1f   : > { %s1615_s2 = sld [smem:[#allocation24_spill]] }
  0x20   : > { %p1275_p13 = pnand %p756_p12, %p1584_p0 }
  0x22   : > { %p898_p2 = pneg %p1275_p13 }
  0x25   : > { %s896_s10 = scalar_lea.hbm %s1615_s2, 512 }
  0x26   : > { %p897_p1 = scmp.ne.s32.totalorder %s1615_s2, %s896_s10  ;;  %p903_p7 = scmp.lt.u32.totalorder %s896_s10, %s1615_s2 }
  0x28   : > { %p899_p3 = pnand %p898_p2, %p897_p1 }
  0x2a   : > { %p900_p5 = pneg %p899_p3 }
  0x2c   : > { %p905_p8 = pnand %p903_p7, %p900_p5 }
  0x2e   : > { %908 = shalt.err (!%p905_p8)
}
  0x2f   : > { %s909_s30 = scalar_lea.vmem %s153_s6, 512  ;;  %p917_p10 = scmp.lt.s32.totalorder %s153_s6, %s153_s6 }
  0x30   : > { %p910_p9 = scmp.ne.s32.totalorder %s153_s6, %s909_s30  ;;  %p918_p6 = scmp.lt.s32.totalorder %s909_s30, %s909_s30 }
  0x32   : > { %p912_p12 = pnand %p910_p9, %p898_p2  ;;  %p919_p4 = por %p918_p6, %p917_p10 }
  0x34   : > { %p913_p0 = pneg %p912_p12 }
  0x36   : > { %p920_p11 = pnand %p919_p4, %p913_p0 }
  0x38   : > { %923 = shalt.err (!%p920_p11)
}
  0x39   : > { %s1588_s8 = smov 128   ;;  %s1589_s9 = smov 8  }
  0x3a   : > { %759 = dma.hbm_to_vmem [thread:$0]  (!%p1275_p13), %s1615_s2, 512, %s153_s6, [#allocation8], %s1588_s8, %s1588_s8, %s1589_s9  }
  0x3b   : > { %s31_s11 = sadd.s32 1, %s1130_s23  ;;  %s34_s15 = sadd.s32 1, %s1134_s24 }
  0x3c   : > { %p32_p0 = scmp.ge.s32.totalorder %s31_s11, 2  ;;  %s43_s27 = sadd.s32 1, %s1118_s20 }
  0x3d   : > { %p50_p4 = scmp.ne.s32.totalorder %s1118_s20, %s1114_s19  ;;  %p51_p6 = scmp.eq.s32.totalorder %s1138_s25, 0 }
  0x3e   : > { %s1662_s11 = smov (%p32_p0, %s31_s11), 0  ;;  %s1664_s15 = smov (!%p32_p0, %s34_s15), %s1134_s24 }
  0x3f   : > { %1616 = sst [smem:[#allocation22_spill]] %s1662_s11  ;;  %s39_s7 = ssub.s32 %s1130_s23, %s1662_s11 }
  0x40   : > { %p1311_p10 = por %p51_p6, %p50_p4  ;;  %p36_p11 = scmp.ge.s32.totalorder %s1664_s15, 2 }
  0x41   : > { %p56_p13 = scmp.ne.s32.totalorder %s1114_s19, %s1110_s18  ;;  %p67_p1 = scmp.eq.s32.totalorder %s39_s7, 0 }
  0x42   : > { %s69_s5 = sadd.s32 1, %s1106_s17  ;;  %s1666_s15 = smov (%p36_p11, %s1664_s15), 0 }
  0x43   : > { %1618 = sst [smem:[#allocation23_spill]] %s1666_s15  ;;  %p1619_p2 = scmp.eq.s32.totalorder %s1241_s26, 0 }
  0x44   : > { %p76_p5 = scmp.ne.s32.totalorder %s1106_s17, %s1102_s16  ;;  %s38_s10 = ssub.s32 %s1134_s24, %s1666_s15 }
  0x45   : > { %p1322_p3 = por %p1619_p2, %p56_p13  ;;  %s116_s8 = sadd.s32 1, %s1094_s14 }
  0x46   : > { %s40_s9 = sor.u32 %s39_s7, %s38_s10  ;;  %p1333_p7 = por %p76_p5, %p51_p6 }
  0x47   : > { %s1620_s30 = scalar_select %p1322_p3, 1, 0 }
  0x48   : > { %p41_p8 = scmp.eq.s32.totalorder %s40_s9, 0  ;;  %p114_p9 = scmp.eq.s32.totalorder %s38_s10, 0 }
  0x49   : > { %s1338_s2 = scalar_select %p67_p1, %s1106_s17, %s69_s5  }
  0x4a   : > { %s1341_s11 = scalar_select %p41_p8, %s1118_s20, %s43_s27  }
  0x4b   : > { %s1344_s12 = scalar_select %p114_p9, %s1094_s14, %s116_s8  }
  0x4c   : > { %p772_p12 = scmp.lt.s32.totalorder %s1138_s25, 4  ;;  %s166_s15 = sand.u32 1, %s1118_s20  }
  0x4d   : > { %s624_s3 = sshll.u32 %s166_s15, 2  ;;  %s625_s7 = sshll.u32 %s1134_s24, 1 }
  0x4e   : > { %s175_s29 = sadd.s32 %s1130_s23, %s625_s7  ;;  %s170_s22 = scalar_lea.vmem [#allocation4], %s624_s3 }
  0x4f   : > { %s179_s21 = sshll.u32 %s170_s22, 4  ;;  %s626_s13 = sshll.u32 %s175_s29, 6  ;;  %s1350_s21 = int_to_ptr.vmem [resolvable:$true] %s179_s21 }
  0x50   : > { %s1355_s10 = scalar_lea.hbm %s1579_s0, %s626_s13  ;;  %p1359_p0 = pnand %p772_p12, %p1311_p10 }
  0x51   : > { %p1365_p4 = pnand %p772_p12, %p1333_p7  ;;  %s186_s22 = sand.u32 1, %s1138_s25  }
  0x52   : > { %s167_s28 = scalar_lea.sflag [#allocation5], %s166_s15  ;;  %s924_s13 = scalar_lea.hbm %s1355_s10, 64 }
  0x53   : > { %p925_p6 = scmp.ne.s32.totalorder %s1355_s10, %s924_s13  ;;  %p926_p11 = pneg %p1359_p0 }
  0x54   : > { %s929_s6 = scalar_lea.hbm %s1579_s0, 256  ;;  %p930_p1 = scmp.lt.u32.totalorder %s1355_s10, %s1579_s0 }
  0x55   : > { %p927_p13 = pnand %p926_p11, %p925_p6  ;;  %p931_p2 = scmp.lt.u32.totalorder %s929_s6, %s924_s13 }
  0x56   : > { %p933_p7 = scmp.lt.u32.totalorder %s924_s13, %s1355_s10 }
  0x57   : > { %p928_p10 = pneg %p927_p13  ;;  %p932_p5 = por %p931_p2, %p930_p1 }
  0x59   : > { %p934_p8 = por %p933_p7, %p932_p5 }
  0x5b   : > { %p935_p9 = pnand %p934_p8, %p928_p10 }
  0x5d   : > { %938 = shalt.err (!%p935_p9)
}
  0x5e   : > { %s939_s15 = scalar_lea.vmem %s1350_s21, 64  ;;  %s1143_s7 = smov [#allocation4]  }
  0x5f   : > { %p940_p12 = scmp.ne.s32.totalorder %s1350_s21, %s939_s15  ;;  %s944_s9 = sshll.u32 %s1143_s7, 4  ;;  %s945_s9 = int_to_ptr.vmem [resolvable:$false] %s944_s9 }
  0x60   : > { %s946_s29 = scalar_lea.vmem %s945_s9, 128  ;;  %p947_p3 = scmp.lt.s32.totalorder %s1350_s21, %s945_s9 }
  0x61   : > { %p942_p6 = pnand %p940_p12, %p926_p11  ;;  %p948_p1 = scmp.lt.s32.totalorder %s946_s29, %s939_s15 }
  0x63   : > { %p943_p13 = pneg %p942_p6  ;;  %p949_p2 = por %p948_p1, %p947_p3 }
  0x65   : > { %p950_p5 = pnand %p949_p2, %p943_p13 }
  0x67   : > { %953 = shalt.err (!%p950_p5)
}
  0x68   : > { %763 = dma.hbm_to_vmem [thread:$0]  (!%p1359_p0), %s1355_s10, 64, %s1350_s21, %s167_s28  }
  0x69   : > { %s188_s13 = sand.u32 1, %s1106_s17   ;;  %s646_s6 = sshll.u32 %s1130_s23, 11 }
  0x6a   : > { %s627_s27 = sshll.u32 %s188_s13, 7  ;;  %s1400_s15 = scalar_lea.hbm %s1580_s1, %s646_s6 }
  0x6b   : > { %s190_s8 = scalar_lea.vmem [#allocation7], %s627_s27  ;;  %s1406_s9 = scalar_lea.sflag [#allocation8], %s186_s22 }
  0x6c   : > { %s197_s7 = sshll.u32 %s190_s8, 4  ;;  %s954_s21 = scalar_lea.hbm %s1400_s15, 2048  ;;  %s1402_s7 = int_to_ptr.vmem [resolvable:$true] %s197_s7 }
  0x6d   : > { %p955_p3 = scmp.ne.s32.totalorder %s1400_s15, %s954_s21  ;;  %p956_p0 = pneg %p1365_p4 }
  0x6e   : > { %s959_s29 = scalar_lea.hbm %s1580_s1, 4096  ;;  %p960_p7 = scmp.lt.u32.totalorder %s1400_s15, %s1580_s1 }
  0x6f   : > { %p957_p11 = pnand %p956_p0, %p955_p3  ;;  %p961_p8 = scmp.lt.u32.totalorder %s959_s29, %s954_s21 }
  0x70   : > { %p963_p12 = scmp.lt.u32.totalorder %s954_s21, %s1400_s15 }
  0x71   : > { %p958_p10 = pneg %p957_p11  ;;  %p962_p9 = por %p961_p8, %p960_p7 }
  0x73   : > { %p964_p6 = por %p963_p12, %p962_p9 }
  0x75   : > { %p965_p13 = pnand %p964_p6, %p958_p10 }
  0x77   : > { %968 = shalt.err (!%p965_p13)
}
  0x78   : > { %s969_s22 = scalar_lea.vmem %s1402_s7, 2048  ;;  %s1144_s6 = smov [#allocation7]  }
  0x79   : > { %p970_p1 = scmp.ne.s32.totalorder %s1402_s7, %s969_s22  ;;  %s974_s5 = sshll.u32 %s1144_s6, 4  ;;  %s975_s5 = int_to_ptr.vmem [resolvable:$false] %s974_s5 }
  0x7a   : > { %s976_s18 = scalar_lea.vmem %s975_s5, 4096  ;;  %p977_p3 = scmp.lt.s32.totalorder %s1402_s7, %s975_s5 }
  0x7b   : > { %p972_p2 = pnand %p970_p1, %p956_p0  ;;  %p978_p11 = scmp.lt.s32.totalorder %s976_s18, %s969_s22 }
  0x7d   : > { %p973_p5 = pneg %p972_p2  ;;  %p979_p7 = por %p978_p11, %p977_p3 }
  0x7f   : > { %p980_p8 = pnand %p979_p7, %p973_p5 }
  0x81   : > { %983 = shalt.err (!%p980_p8)
}
  0x82   : > { %s1624_s8 = smov 8   ;;  %s1625_s21 = smov 128  }
  0x83   : > { %766 = dma.hbm_to_vmem [thread:$0]  (!%p1365_p4), %s1400_s15, 2048, %s1402_s7, %s1406_s9, %s1625_s21, %s1625_s21, %s1624_s8  }
  0x84   : > { %p1626_p0 = scmp.ne.s32.totalorder %s1613_s4, 0 }
  0x85   : > { %s211_s10 = sand.u32 (!%p1626_p0), 1, %s1114_s19   ;;  %p1627_p10 = scmp.ne.s32.totalorder (!%p1626_p0), %s1620_s30, 0 }
  0x86   : > { %209 = sbr.rel (%p1626_p0) target bundleno = 683 (0x2ab), region = 32  ;;  %s1440_s28 = sshll.u32 (!%p1626_p0), %s211_s10, 2 }
  0x87   : > { %s212_s29 = scalar_lea.sflag (!%p1626_p0), [#allocation5], %s211_s10  ;;  %s215_s13 = scalar_lea.vmem (!%p1626_p0), [#allocation4], %s1440_s28 }
  0x8d   : > { %1069 = dma.done.wait (%p1627_p10), %s212_s29, 64  }
  0x8e   : > { %1071 = vsyncadd (%p1627_p10), %s212_s29, 4294967232  ;;  %s1628_s3 = sld [smem:[#allocation19_spill]]  ;;  %s220_s15 = sand.u32 1, %s1241_s26  }
  0x8f   : > { %s222_s7 = sand.u32 1, %s1102_s16   ;;  %s221_s9 = scalar_lea.sflag [#allocation8], %s220_s15 }
  0x90   : > { %s632_s4 = sshll.u32 %s222_s7, 7 }
  0x91   : > { %s1449_s27 = scalar_lea.vmem [#allocation7], %s632_s4 }
  0x94   : > { %p1629_p4 = scmp.ne.s32.totalorder %s1628_s3, 0 }
  0x96   : > { %1073 = dma.done.wait (%p1629_p4), %s221_s9, 2048  }
  0x97   : > { %1075 = vsyncadd (%p1629_p4), %s221_s9, 4294965248  ;;  %p1630_p9 = scmp.eq.s32.totalorder %s1241_s26, 0 }
  0x99   : > { %1077 = dma.done.wait (%p1630_p9), [#allocation8], 512   ;;  %p1631_p12 = pmov %p1630_p9 }
  0x9a   : > { %s1632_s30 = sld [smem:[#allocation16_spill]]  ;;  %s1633_s18 = sld [smem:[#allocation17_spill]] }
  0x9b   : > { %1079 = vsyncadd (%p1631_p12), [#allocation8], 4294966784 }
  0xa0   : > { %s253_s22 = sand.u32 1, %s1632_s30   ;;  %p635_p6 = scmp.ne.s32.totalorder %s1633_s18, 0 }
  0xa1   : > { %s634_s6 = sshll.u32 %s253_s22, 5  ;;  %v1145_v0 = vmov (!%p635_p6), 0.0  }
  0xa2   : > { %s1462_s5 = scalar_lea.vmem [#allocation10], %s634_s6  ;;  %260 = sbr.rel (%p635_p6) target bundleno = 169 (0xa9), region = 48  ;;  %261 = vst [vmem:[#allocation2] sm:$0xf] (!%p635_p6), %v1145_v0 }
  0xa9 PF: > { %v264_v1 = vld [vmem:[%s1449_s27] sm:$0xff]  ;;  %v265_v2 = vld [vmem:[%s1449_s27 + $0x8] sm:$0xff]  ;;  %v266_v3 = vld [vmem:[%s1449_s27 + $0x10] sm:$0xff]  ;;  %v1146_v4 = vmov 0.0|0.0   ;;  %vm1147_vm0 = vmmov 0   ;;  %v1148_v7 = vmov 0.0  }
  0xaa   : > { %716 = vmatprep.subr.bf16.mxu0 %v1146_v4  ;;  %v717_v5 = vpack.c.bf16 %v265_v2, %v264_v1  ;;  %v267_v6 = vld [vmem:[%s1449_s27 + $0x18] sm:$0xff]  ;;  %703 = vmatprep.mubr.msk.f32.mxu0 %vm1147_vm0, %v1148_v7  ;;  %v268_v9 = vld [vmem:[%s1449_s27 + $0x20] sm:$0xff]  ;;  %v269_v10 = vld [vmem:[%s1449_s27 + $0x28] sm:$0xff]  ;;  %s1634_s26 = sld [smem:[#allocation17_spill]] }
  0xab   : > { %v720_v8 = vpack.c.bf16 %v267_v6, %v266_v3  ;;  %v723_v11 = vpack.c.bf16 %v269_v10, %v268_v9  ;;  %v270_v12 = vld [vmem:[%s1449_s27 + $0x30] sm:$0xff]  ;;  %v271_v13 = vld [vmem:[%s1449_s27 + $0x38] sm:$0xff]  ;;  %v272_v15 = vld [vmem:[%s1449_s27 + $0x40] sm:$0xff] }
  0xac   : > { %718 = vmatpush3.bf16.msra.mxu0 %v717_v5  ;;  %v726_v14 = vpack.c.bf16 %v271_v13, %v270_v12  ;;  %v273_v16 = vld [vmem:[%s1449_s27 + $0x48] sm:$0xff]  ;;  %v274_v18 = vld [vmem:[%s1449_s27 + $0x50] sm:$0xff]  ;;  %v275_v19 = vld [vmem:[%s1449_s27 + $0x58] sm:$0xff] }
  0xad   : > { %719 = vmatprep.subr.bf16.mxu0 %v1146_v4  ;;  %v729_v17 = vpack.c.bf16 %v273_v16, %v272_v15  ;;  %v732_v20 = vpack.c.bf16 %v275_v19, %v274_v18  ;;  %v276_v21 = vld [vmem:[%s1449_s27 + $0x60] sm:$0xff]  ;;  %v277_v22 = vld [vmem:[%s1449_s27 + $0x68] sm:$0xff]  ;;  %v278_v24 = vld [vmem:[%s1449_s27 + $0x70] sm:$0xff] }
  0xae   : > { %v735_v23 = vpack.c.bf16 %v277_v22, %v276_v21  ;;  %v279_v25 = vld [vmem:[%s1449_s27 + $0x78] sm:$0xff]  ;;  %v262_v28 = vld [vmem:[#allocation2] sm:$0xf] }
  0xaf   : > { %v738_v26 = vpack.c.bf16 %v279_v25, %v278_v24  ;;  %v263_v27 = vld [vmem:[%s215_s13] sm:$0xf] }
  0xb0   : > { %721 = vmatpush3.bf16.msra.mxu0 %v720_v8  ;;  %p636_p13 = scmp.ne.s32.totalorder %s1634_s26, 1 }
  0xb1   : > { %722 = vmatprep.subr.bf16.mxu0 %v1146_v4  ;;  %v357_v32 = vlaneseq (!%p636_p13)  ;;  %v379_v33 = vld [vmem:[#allocation9] sm:$0xff] (!%p636_p13)  ;;  %vm385_vm1 = vcmask (!%p636_p13), 130048   ;;  %v381_v34 = vld [vmem:[#allocation9 + $0x10] sm:$0xff] (!%p636_p13)  ;;  %v380_v44 = vld [vmem:[#allocation9 + $0x8] sm:$0xff] (!%p636_p13) }
  0xb2   : > { %713 = vmatprep.mubr.msk.f32.mxu1 (!%p636_p13), %vm385_vm1, %v381_v34  ;;  %v382_v45 = vld [vmem:[#allocation9 + $0x18] sm:$0xff] (!%p636_p13) }
  0xb3   : > { %v358_v36 = vand.u32 (!%p636_p13), 127, %v357_v32 }
  0xb4   : > { %724 = vmatpush3.bf16.msra.mxu0 %v723_v11 }
  0xb5   : > { %725 = vmatprep.subr.bf16.mxu0 %v1146_v4  ;;  %vm360_vm2 = vcmp.lt.s32.totalorder (!%p636_p13), %v358_v36, 1  ;;  %vm364_vm3 = vcmp.ge.s32.totalorder (!%p636_p13), %v358_v36, 1  ;;  %vm365_vm4 = vcmp.lt.s32.totalorder (!%p636_p13), %v358_v36, 5  ;;  %vm369_vm5 = vcmp.ge.s32.totalorder (!%p636_p13), %v358_v36, 5 }
  0xb6   : > { %vm366_vm6 = vmand (!%p636_p13), %vm364_vm3, %vm365_vm4  ;;  %vm370_vm7 = vcmp.lt.s32.totalorder (!%p636_p13), %v358_v36, 14  ;;  %vm374_vm8 = vcmp.ge.s32.totalorder (!%p636_p13), %v358_v36, 14  ;;  %vm375_vm9 = vcmp.lt.s32.totalorder (!%p636_p13), %v358_v36, 50 }
  0xb7   : > { %vm371_vm10 = vmand (!%p636_p13), %vm369_vm5, %vm370_vm7 }
  0xb8   : > { %727 = vmatpush3.bf16.msra.mxu0 %v726_v14  ;;  %vm376_vm11 = vmand (!%p636_p13), %vm374_vm8, %vm375_vm9 }
  0xb9   : > { %728 = vmatprep.subr.bf16.mxu0 %v1146_v4 }
  0xbc   : > { %730 = vmatpush3.bf16.msra.mxu0 %v729_v17 }
  0xbd   : > { %731 = vmatprep.subr.bf16.mxu0 %v1146_v4 }
  0xc0   : > { %733 = vmatpush3.bf16.msra.mxu0 %v732_v20 }
  0xc1   : > { %734 = vmatprep.subr.bf16.mxu0 %v1146_v4 }
  0xc4   : > { %736 = vmatpush3.bf16.msra.mxu0 %v735_v23 }
  0xc5   : > { %737 = vmatprep.subr.bf16.mxu0 %v1146_v4 }
  0xc8   : > { %739 = vmatpush3.bf16.msra.mxu0 %v738_v26 }
  0xcb   : > { %704 = vmatmul.mubr.f32.vlgmr.msra.gmra.mrb[0].mxu0 %v263_v27 }
  0xcc   : > { %710 = vmatprep.mubr.msk.f32.mxu0 (!%p636_p13), %vm385_vm1, %v379_v33 }
 0x19b   : > { %355 = sbr.rel (%p636_p13) target bundleno = 655 (0x28f), region = 52 }
 0x19e   : > { %v346_v29 = vpop.f32.mrb[0].mxu0 }
 0x19f   : > { %v350_v30 = vadd.f32 %v346_v29, %v262_v28  ;;  %v705_v31 = vpop.f32.mrb[1].mxu0 }
 0x1a1   : > { %351 = vst [vmem:[#allocation2] sm:$0xf] %v350_v30 }
 0x1a8   : > { %v356_v35 = vld [vmem:[#allocation2] sm:$0xf] }
 0x1a9   : > { %v362_v37 = vsel %vm360_vm2, %v356_v35, 0.0  ;;  %v367_v38 = vsel %vm366_vm6, %v356_v35, 0.0  ;;  %v372_v39 = vsel %vm371_vm10, %v356_v35, 0.0  ;;  %v377_v40 = vsel %vm376_vm11, %v356_v35, 0.0 }
 0x1aa   : > { %363 = vst [vmem:[#allocation3] sm:$0xf] %v362_v37  ;;  %368 = vst [vmem:[#allocation3 + $0x4] sm:$0xf] %v367_v38 }
 0x1ab   : > { %373 = vst [vmem:[#allocation3 + $0x8] sm:$0xf] %v372_v39  ;;  %378 = vst [vmem:[#allocation3 + $0xc] sm:$0xf] %v377_v40 }
 0x1b1   : > { %v383_v41 = vld [vmem:[#allocation3] sm:$0xff] }
 0x1b2   : > { %v384_v42 = vld [vmem:[#allocation3 + $0x8] sm:$0xff] }
 0x1b3   : > { %v740_v43 = vpack.c.bf16 %v384_v42, %v383_v41 }
 0x1b5   : > { %741 = vmatprep.subr.bf16.mxu0 %v740_v43  ;;  %744 = vmatprep.subr.bf16.mxu1 %v740_v43 }
 0x1b6   : > { %743 = vmatpush3.bf16.msra.mxu0 %v740_v43  ;;  %745 = vmatpush3.bf16.msra.mxu1 %v740_v43 }
 0x1b9   : > { %711 = vmatmul.mubr.msk.f32.vlgmr.msra.gmra.mrb[0].mxu0 %vm385_vm1, %v380_v44  ;;  %714 = vmatmul.mubr.msk.f32.vlgmr.msra.gmra.mrb[0].mxu1 %vm385_vm1, %v382_v45 }
 0x28c   : > { %v712_v46 = vpop.f32.mrb[0].mxu0  ;;  %v715_v47 = vpop.f32.mrb[0].mxu1 }
 0x28d   : > { %484 = vst [vmem:[%s1462_s5 + $0x8] sm:$0xff] %v712_v46  ;;  %486 = vst [vmem:[%s1462_s5 + $0x18] sm:$0xff] %v715_v47  ;;  %v464_v48 = vpop.f32.mrb[1].mxu0  ;;  %v474_v49 = vpop.f32.mrb[1].mxu1 }
 0x28e   : > { %483 = vst [vmem:[%s1462_s5] sm:$0xff] %v464_v48  ;;  %485 = vst [vmem:[%s1462_s5 + $0x10] sm:$0xff] %v474_v49 }
 0x28f PF: > { %s1635_s8 = sld [smem:[#allocation18_spill]]  ;;  %s1637_s10 = sld [smem:[#allocation20_spill]] }
 0x290   : > { %s1638_s3 = sld [smem:[#allocation25_spill]]  ;;  %s501_s7 = sshll.u32 %s1462_s5, 4  ;;  %s1499_s7 = int_to_ptr.vmem [resolvable:$true] %s501_s7 }
 0x291   : > { %s1503_s4 = scalar_lea.sflag [#allocation6], %s253_s22  ;;  %s984_s9 = scalar_lea.vmem %s1499_s7, 512 }
 0x292   : > { %p985_p1 = scmp.ne.s32.totalorder %s1499_s7, %s984_s9  ;;  %s1149_s27 = smov [#allocation10]  }
 0x293   : > { %s988_s30 = sshll.u32 %s1149_s27, 4  ;;  %s989_s30 = int_to_ptr.vmem [resolvable:$false] %s988_s30 }
 0x294   : > { %s990_s6 = scalar_lea.vmem %s989_s30, 1024  ;;  %p991_p11 = scmp.lt.s32.totalorder %s1499_s7, %s989_s30 }
 0x295   : > { %s647_s28 = sshll.u32 %s1635_s8, 9  ;;  %p1639_p2 = scmp.ne.s32.totalorder %s1637_s10, 0 }
 0x296   : > { %s1496_s15 = scalar_lea.hbm %s1638_s3, %s647_s28  ;;  %p992_p7 = scmp.lt.s32.totalorder %s990_s6, %s984_s9 }
 0x297   : > { %p986_p5 = pnand %p985_p1, %p1639_p2 }
 0x298   : > { %p993_p8 = por %p992_p7, %p991_p11 }
 0x299   : > { %p987_p3 = pneg %p986_p5 }
 0x29b   : > { %p994_p0 = pnand %p993_p8, %p987_p3 }
 0x29d   : > { %997 = shalt.err (!%p994_p0)
}
 0x29e   : > { %s998_s22 = scalar_lea.hbm %s1496_s15, 512  ;;  %s1002_s26 = scalar_lea.hbm %s1638_s3, 1024 }
 0x29f   : > { %p999_p10 = scmp.ne.s32.totalorder %s1496_s15, %s998_s22  ;;  %p1003_p12 = scmp.lt.u32.totalorder %s1496_s15, %s1638_s3 }
 0x2a0   : > { %p1004_p6 = scmp.lt.u32.totalorder %s1002_s26, %s998_s22  ;;  %p1006_p1 = scmp.lt.u32.totalorder %s998_s22, %s1496_s15 }
 0x2a1   : > { %p1000_p4 = pnand %p999_p10, %p1639_p2 }
 0x2a2   : > { %p1005_p13 = por %p1004_p6, %p1003_p12 }
 0x2a3   : > { %p1001_p9 = pneg %p1000_p4 }
 0x2a4   : > { %p1007_p5 = por %p1006_p1, %p1005_p13 }
 0x2a6   : > { %p1008_p3 = pnand %p1007_p5, %p1001_p9 }
 0x2a8   : > { %1011 = shalt.err (!%p1008_p3)
}
 0x2a9   : > { %s1150_s28 = smov 128   ;;  %s1151_s29 = smov 8  }
 0x2aa   : > { %754 = dma.vmem_to_hbm [thread:$0]  (%p1639_p2), %s1499_s7, 512, %s1496_s15, %s1503_s4, %s1150_s28, %s1150_s28, %s1151_s29  }
 0x2ab PF: > { %s1640_s13 = sld [smem:[#allocation15_spill]]  ;;  %s1641_s9 = sld [smem:[#allocation21_spill]] }
 0x2ac   : > { %p774_p11 = scmp.ge.s32.totalorder %s1138_s25, 2 }
 0x2b1   : > { %s516_s27 = sand.u32 1, %s1640_s13   ;;  %p1642_p7 = scmp.ne.s32.totalorder %s1641_s9, 0 }
 0x2b2   : > { %s517_s30 = scalar_lea.sflag [#allocation6], %s516_s27 }
 0x2b3   : > { %p768_p8 = pnand %p774_p11, %p1642_p7 }
 0x2b5   : > { %1081 = dma.done.wait (!%p768_p8), %s517_s30, 512  }
 0x2b6   : > { %1083 = vsyncadd (!%p768_p8), %s517_s30, 4294966784  ;;  %s22_s25 = sadd.s32 1, %s1138_s25   ;;  %s1644_s22 = sld [smem:[#allocation16_spill]] }
 0x2b7   : > { %p1532_p0 = scmp.ge.s32.totalorder %s22_s25, 6   ;;  %s1645_s10 = smov %s1344_s12 }
 0x2b8   : > { %s1646_s7 = sld [smem:[#allocation22_spill]]  ;;  %s1647_s4 = sld [smem:[#allocation23_spill]] }
 0x2b9   : > { %s1649_s13 = smov %s1094_s14  ;;  %s1650_s14 = smov %s1645_s10 }
 0x2ba   : > { %s1651_s15 = smov %s1102_s16  ;;  %s1652_s16 = smov %s1106_s17 }
 0x2bb   : > { %s1653_s17 = smov %s1338_s2  ;;  %s1654_s18 = smov %s1114_s19 }
 0x2bc   : > { %s1648_s12 = smov %s1644_s22  ;;  %s1655_s19 = smov %s1118_s20 }
 0x2bd   : > { %s1656_s20 = smov %s1341_s11  ;;  %s1657_s21 = smov %s1130_s23 }
 0x2be   : > { %s1658_s22 = smov %s1134_s24  ;;  %s1659_s23 = smov %s1646_s7 }
 0x2bf   : > { %s1660_s24 = smov %s1647_s4  ;;  %21 = sbr.rel (!%p1532_p0) target bundleno = 15 (0xf), region = 102 }
 0x2c6   :  { %522 = vsyncpa [#allocation5], 1 }
 0x2c7   :  { %524 = vsyncpa [#allocation5 + $0x1], 1 }
 0x2c8   :  { %525 = vsyncpa [#allocation8], 1 }
 0x2c9   :  { %527 = vsyncpa [#allocation8 + $0x1], 1 }
 0x2ca   :  { %528 = vsyncpa [#allocation6], 1 }
 0x2cb   :  { %530 = vsyncpa [#allocation6 + $0x1], 1 }

</bundles_post_ra>
